<compile_context>
chip_gen: v6e
topology: v6e:2x2x1
jax: 0.10.0
libtpu: 0.0.40
codegen_flags: <defaults>
</compile_context>

<pallas_src>
import functools

import jax
import jax.numpy as jnp
from jax.experimental import pallas as pl
from jax.experimental.pallas import tpu as pltpu


# ---------------------------------------------------------------------------
# Fused Pallas kernel: entire forward pass in one call
# ---------------------------------------------------------------------------
def _fused_forward_kernel(x_ref, w1_ref, b1_ref, wa_ref, ba_ref, wb_ref, bb_ref,
                          w2_ref, b2_ref, o_ref, *, num_stage):
    """o = w2( stages( relu(bn1(w1(x))) ) )  with BN pre-folded, dropout = identity.

    x:[B,K_in] f32; w1:[K_in,H] bf16; b1:[1,H] f32;
    wa,wb:[S,H,H] bf16; ba,bb:[S,1,H] f32; w2:[H,Npad] bf16; b2:[1,Npad] f32.
    """
    x = x_ref[...]

    # y = relu(x @ w1 + b1)          (bf16 MXU inputs, f32 accumulation + epilogue)
    y = jnp.dot(x.astype(jnp.bfloat16), w1_ref[...],
                preferred_element_type=jnp.float32) + b1_ref[...]
    y = jnp.maximum(y, 0.0)

    # Residual stages (num_stage is small & static -> fully unrolled Python loop;
    # static ref indexing wa_ref[i] is free).
    for i in range(num_stage):
        h = jnp.dot(y.astype(jnp.bfloat16), wa_ref[i],
                    preferred_element_type=jnp.float32) + ba_ref[i]
        h = jnp.maximum(h, 0.0)
        z = jnp.dot(h.astype(jnp.bfloat16), wb_ref[i],
                    preferred_element_type=jnp.float32) + bb_ref[i]
        z = jnp.maximum(z, 0.0)
        y = y + z

    # Final projection (no BN / relu); output is lane-padded to a multiple of 128 so the
    # store is an unmasked lane-dense vst.
    out = jnp.dot(y.astype(jnp.bfloat16), w2_ref[...],
                  preferred_element_type=jnp.float32) + b2_ref[...]
    o_ref[...] = out.astype(o_ref.dtype)


def _run_fused(x, w1, b1, wa, ba, wb, bb, w2, b2):
    """Single pallas_call over the full (VMEM-resident) problem. No grid needed."""
    B = x.shape[0]
    n_pad = w2.shape[1]
    num_stage = wa.shape[0]
    args = (x, w1, b1, wa, ba, wb, bb, w2, b2)

    def full_spec(a):
        return pl.BlockSpec(a.shape, lambda: (0,) * a.ndim)

    return pl.pallas_call(
        functools.partial(_fused_forward_kernel, num_stage=num_stage),
        out_shape=jax.ShapeDtypeStruct((B, n_pad), jnp.float32),
        in_specs=[full_spec(a) for a in args],
        out_specs=pl.BlockSpec((B, n_pad), lambda: (0, 0)),
        compiler_params=pltpu.CompilerParams(vmem_limit_bytes=32 * 1024 * 1024),
    )(*args)


@functools.partial(jax.jit, static_argnames=("out_size",))
def _forward_impl(x, arrays, *, out_size):
    B = x.shape[0]
    b_pad = max(((B + 7) // 8) * 8, 8)          # sublane-align the batch dim
    if b_pad != B:
        x = jnp.pad(x, ((0, b_pad - B), (0, 0)))
    out = _run_fused(x, arrays["w1"], arrays["b1"], arrays["wa"], arrays["ba"],
                     arrays["wb"], arrays["bb"], arrays["w2"], arrays["b2"])
    return out[:B, :out_size]


def linear_model_forward(x, folded):
    """Run the fused forward; returns [B, output_size] f32."""
    arrays = {k: v for k, v in folded.items() if k != "out_size"}
    return _forward_impl(x, arrays, out_size=folded["out_size"])


# ---------------------------------------------------------------------------
# Plain-JAX glue: parameter construction + one-time BN folding / packing
# ---------------------------------------------------------------------------
def fold_bn_into_linear(w, b, gamma, beta, mean, var, eps=1e-5):
    """Fold eval-mode BatchNorm1d into a preceding Linear (w:[K,N], b:[N])."""
    s = gamma / jnp.sqrt(var + eps)
    w_f = w * s[None, :]
    b_f = (b - mean) * s + beta
    return w_f, b_f


def prepare_folded_params(params, lane=128):
    """Fold BN, stack stage weights, cast matmul weights to bf16, pad final N to 128.

    Runs ONCE at setup time; the forward path never re-does this work.
    """
    w1f, b1f = fold_bn_into_linear(params["w1"], params["b1"], *params["bn1"])

    was, bas, wbs, bbs = [], [], [], []
    for wa, ba, bna, wb, bb, bnb in params["stages"]:
        waf, baf = fold_bn_into_linear(wa, ba, *bna)
        wbf, bbf = fold_bn_into_linear(wb, bb, *bnb)
        was.append(waf)
        bas.append(baf)
        wbs.append(wbf)
        bbs.append(bbf)

    w2, b2 = params["w2"], params["b2"]
    H, N = w2.shape
    n_pad = max(((N + lane - 1) // lane) * lane, lane)
    w2p = jnp.zeros((H, n_pad), jnp.float32).at[:, :N].set(w2)
    b2p = jnp.zeros((n_pad,), jnp.float32).at[:N].set(b2)

    S = len(was)
    return {
        "w1": w1f.astype(jnp.bfloat16),
        "b1": b1f.reshape(1, -1),
        "wa": jnp.stack(was).astype(jnp.bfloat16),            # [S, H, H]
        "ba": jnp.stack(bas).reshape(S, 1, -1),                # [S, 1, H] f32
        "wb": jnp.stack(wbs).astype(jnp.bfloat16),             # [S, H, H]
        "bb": jnp.stack(bbs).reshape(S, 1, -1),                # [S, 1, H] f32
        "w2": w2p.astype(jnp.bfloat16),                        # [H, n_pad]
        "b2": b2p.reshape(1, -1),                              # [1, n_pad] f32
        "out_size": N,
    }


def make_params(key, input_size, output_size, linear_size, num_stage):
    def nxt():
        nonlocal key
        key, sub = jax.random.split(key)
        return sub

    def lin(k_in, k_out):
        w = jax.random.normal(nxt(), (k_in, k_out), jnp.float32) * 0.05
        b = jax.random.normal(nxt(), (k_out,), jnp.float32) * 0.05
        return w, b

    def bn(n):
        gamma = 1.0 + 0.1 * jax.random.normal(nxt(), (n,), jnp.float32)
        beta = 0.1 * jax.random.normal(nxt(), (n,), jnp.float32)
        mean = 0.1 * jax.random.normal(nxt(), (n,), jnp.float32)
        var = jax.random.uniform(nxt(), (n,), jnp.float32, 0.5, 1.5)
        return gamma, beta, mean, var

    params = {}
    params["w1"], params["b1"] = lin(input_size, linear_size)
    params["bn1"] = bn(linear_size)
    params["stages"] = []
    for _ in range(num_stage):
        wa, ba = lin(linear_size, linear_size)
        bna = bn(linear_size)
        wb, bb = lin(linear_size, linear_size)
        bnb = bn(linear_size)
        params["stages"].append((wa, ba, bna, wb, bb, bnb))
    params["w2"], params["b2"] = lin(linear_size, output_size)
    return params


# ---------------------------------------------------------------------------
# Pure-JAX references
# ---------------------------------------------------------------------------
def reference_forward_f32(x, params):
    """Exact f32 model semantics (eval mode: BN running stats, dropout = identity)."""
    w1f, b1f = fold_bn_into_linear(params["w1"], params["b1"], *params["bn1"])
    y = jnp.maximum(x @ w1f + b1f[None, :], 0.0)
    for wa, ba, bna, wb, bb, bnb in params["stages"]:
        waf, baf = fold_bn_into_linear(wa, ba, *bna)
        wbf, bbf = fold_bn_into_linear(wb, bb, *bnb)
        h = jnp.maximum(y @ waf + baf[None, :], 0.0)
        z = jnp.maximum(h @ wbf + bbf[None, :], 0.0)
        y = y + z
    return y @ params["w2"] + params["b2"][None, :]


def reference_forward_bf16(x, folded):
    """Same bf16-cast weights / bf16 dot inputs as the kernel, computed in plain JAX."""
    f32 = lambda a: a.astype(jnp.float32)
    castrt = lambda a: a.astype(jnp.bfloat16).astype(jnp.float32)
    y = jnp.maximum(castrt(x) @ f32(folded["w1"]) + folded["b1"], 0.0)
    for i in range(folded["wa"].shape[0]):
        h = jnp.maximum(castrt(y) @ f32(folded["wa"][i]) + folded["ba"][i], 0.0)
        z = jnp.maximum(castrt(h) @ f32(folded["wb"][i]) + folded["bb"][i], 0.0)
        y = y + z
    out = castrt(y) @ f32(folded["w2"]) + folded["b2"]
    return out[:, :folded["out_size"]]


if __name__ == "__main__":
    # Small shapes consistent with the module: batch of feature vectors.
    batch = 8
    input_size = 32
    output_size = 16
    linear_size = 128
    num_stage = 2

    key = jax.random.PRNGKey(0)
    key, xkey = jax.random.split(key)
    x = jax.random.normal(xkey, (batch, input_size), jnp.float32)

    params = make_params(key, input_size, output_size, linear_size, num_stage)
    folded = prepare_folded_params(params)          # BN folding / bf16 cast done ONCE

    out = linear_model_forward(x, folded)
    out = jax.block_until_ready(out)
    assert out.shape == (batch, output_size)

    # Tight check against a reference using the identical bf16-cast weights.
    ref_bf16 = reference_forward_bf16(x, folded)
    assert jnp.allclose(out, ref_bf16, atol=1e-3, rtol=1e-3), "mismatch vs bf16-weight reference"

    # Loosened check vs. the exact f32 model: tolerance widened to 2e-2 purely because the
    # kernel intentionally uses bf16 matmul inputs (f32 accumulation), per perf guidance.
    ref_f32 = reference_forward_f32(x, params)
    assert jnp.allclose(out, ref_f32, atol=2e-2, rtol=2e-2), "mismatch vs f32 reference"

    print("KERNEL_OK")
</pallas_src>

<mosaic_0001>
module attributes {stable_mosaic.version = 11 : i64} {
  func.func @_fused_forward_kernel(%arg0: memref<8x32xf32, #tpu.memory_space<vmem>>, %arg1: memref<32x128xbf16, #tpu.memory_space<vmem>>, %arg2: memref<1x128xf32, #tpu.memory_space<vmem>>, %arg3: memref<2x128x128xbf16, #tpu.memory_space<vmem>>, %arg4: memref<2x1x128xf32, #tpu.memory_space<vmem>>, %arg5: memref<2x128x128xbf16, #tpu.memory_space<vmem>>, %arg6: memref<2x1x128xf32, #tpu.memory_space<vmem>>, %arg7: memref<128x128xbf16, #tpu.memory_space<vmem>>, %arg8: memref<1x128xf32, #tpu.memory_space<vmem>>, %arg9: memref<8x128xf32, #tpu.memory_space<vmem>>) attributes {dimension_semantics = [], scalar_prefetch = 0 : i64, scratch_operands = 0 : i64, tpu.core_type = #tpu.core_type<tc>} {
    %c0 = arith.constant 0 : index
    %c0_0 = arith.constant 0 : index
    %0 = vector.load %arg0[%c0, %c0_0] : memref<8x32xf32, #tpu.memory_space<vmem>>, vector<8x32xf32>
    %1 = arith.truncf %0 : vector<8x32xf32> to vector<8x32xbf16>
    %c0_1 = arith.constant 0 : index
    %c0_2 = arith.constant 0 : index
    %2 = vector.load %arg1[%c0_1, %c0_2] : memref<32x128xbf16, #tpu.memory_space<vmem>>, vector<32x128xbf16>
    %cst = arith.constant dense<0.000000e+00> : vector<8x128xf32>
    %3 = tpu.matmul %1, %2, %cst {dimension_numbers = #tpu.dot_dimension_numbers<[1], [0], [0], [1], [0, 0, 1, 1], [], []>} : vector<8x32xbf16>, vector<32x128xbf16>, vector<8x128xf32> -> vector<8x128xf32>
    %c0_3 = arith.constant 0 : index
    %c0_4 = arith.constant 0 : index
    %4 = vector.load %arg2[%c0_3, %c0_4] : memref<1x128xf32, #tpu.memory_space<vmem>>, vector<1x128xf32>
    %5 = vector.broadcast %4 : vector<1x128xf32> to vector<8x128xf32>
    %6 = arith.addf %3, %5 : vector<8x128xf32>
    %cst_5 = arith.constant 0.000000e+00 : f32
    %7 = vector.broadcast %cst_5 : f32 to vector<8x128xf32>
    %8 = arith.maximumf %6, %7 : vector<8x128xf32>
    %9 = arith.truncf %8 : vector<8x128xf32> to vector<8x128xbf16>
    %c0_6 = arith.constant 0 : index
    %c0_7 = arith.constant 0 : index
    %c0_8 = arith.constant 0 : index
    %10 = vector.load %arg3[%c0_6, %c0_7, %c0_8] : memref<2x128x128xbf16, #tpu.memory_space<vmem>>, vector<1x128x128xbf16>
    %11 = vector.shape_cast %10 : vector<1x128x128xbf16> to vector<128x128xbf16>
    %cst_9 = arith.constant dense<0.000000e+00> : vector<8x128xf32>
    %12 = tpu.matmul %9, %11, %cst_9 {dimension_numbers = #tpu.dot_dimension_numbers<[1], [0], [0], [1], [0, 0, 1, 1], [], []>} : vector<8x128xbf16>, vector<128x128xbf16>, vector<8x128xf32> -> vector<8x128xf32>
    %c0_10 = arith.constant 0 : index
    %c0_11 = arith.constant 0 : index
    %c0_12 = arith.constant 0 : index
    %13 = vector.load %arg4[%c0_10, %c0_11, %c0_12] : memref<2x1x128xf32, #tpu.memory_space<vmem>>, vector<1x1x128xf32>
    %14 = vector.shape_cast %13 : vector<1x1x128xf32> to vector<1x128xf32>
    %15 = vector.broadcast %14 : vector<1x128xf32> to vector<8x128xf32>
    %16 = arith.addf %12, %15 : vector<8x128xf32>
    %cst_13 = arith.constant 0.000000e+00 : f32
    %17 = vector.broadcast %cst_13 : f32 to vector<8x128xf32>
    %18 = arith.maximumf %16, %17 : vector<8x128xf32>
    %19 = arith.truncf %18 : vector<8x128xf32> to vector<8x128xbf16>
    %c0_14 = arith.constant 0 : index
    %c0_15 = arith.constant 0 : index
    %c0_16 = arith.constant 0 : index
    %20 = vector.load %arg5[%c0_14, %c0_15, %c0_16] : memref<2x128x128xbf16, #tpu.memory_space<vmem>>, vector<1x128x128xbf16>
    %21 = vector.shape_cast %20 : vector<1x128x128xbf16> to vector<128x128xbf16>
    %cst_17 = arith.constant dense<0.000000e+00> : vector<8x128xf32>
    %22 = tpu.matmul %19, %21, %cst_17 {dimension_numbers = #tpu.dot_dimension_numbers<[1], [0], [0], [1], [0, 0, 1, 1], [], []>} : vector<8x128xbf16>, vector<128x128xbf16>, vector<8x128xf32> -> vector<8x128xf32>
    %c0_18 = arith.constant 0 : index
    %c0_19 = arith.constant 0 : index
    %c0_20 = arith.constant 0 : index
    %23 = vector.load %arg6[%c0_18, %c0_19, %c0_20] : memref<2x1x128xf32, #tpu.memory_space<vmem>>, vector<1x1x128xf32>
    %24 = vector.shape_cast %23 : vector<1x1x128xf32> to vector<1x128xf32>
    %25 = vector.broadcast %24 : vector<1x128xf32> to vector<8x128xf32>
    %26 = arith.addf %22, %25 : vector<8x128xf32>
    %cst_21 = arith.constant 0.000000e+00 : f32
    %27 = vector.broadcast %cst_21 : f32 to vector<8x128xf32>
    %28 = arith.maximumf %26, %27 : vector<8x128xf32>
    %29 = arith.addf %8, %28 : vector<8x128xf32>
    %30 = arith.truncf %29 : vector<8x128xf32> to vector<8x128xbf16>
    %c1 = arith.constant 1 : index
    %c0_22 = arith.constant 0 : index
    %c0_23 = arith.constant 0 : index
    %31 = vector.load %arg3[%c1, %c0_22, %c0_23] : memref<2x128x128xbf16, #tpu.memory_space<vmem>>, vector<1x128x128xbf16>
    %32 = vector.shape_cast %31 : vector<1x128x128xbf16> to vector<128x128xbf16>
    %cst_24 = arith.constant dense<0.000000e+00> : vector<8x128xf32>
    %33 = tpu.matmul %30, %32, %cst_24 {dimension_numbers = #tpu.dot_dimension_numbers<[1], [0], [0], [1], [0, 0, 1, 1], [], []>} : vector<8x128xbf16>, vector<128x128xbf16>, vector<8x128xf32> -> vector<8x128xf32>
    %c1_25 = arith.constant 1 : index
    %c0_26 = arith.constant 0 : index
    %c0_27 = arith.constant 0 : index
    %34 = vector.load %arg4[%c1_25, %c0_26, %c0_27] : memref<2x1x128xf32, #tpu.memory_space<vmem>>, vector<1x1x128xf32>
    %35 = vector.shape_cast %34 : vector<1x1x128xf32> to vector<1x128xf32>
    %36 = vector.broadcast %35 : vector<1x128xf32> to vector<8x128xf32>
    %37 = arith.addf %33, %36 : vector<8x128xf32>
    %cst_28 = arith.constant 0.000000e+00 : f32
    %38 = vector.broadcast %cst_28 : f32 to vector<8x128xf32>
    %39 = arith.maximumf %37, %38 : vector<8x128xf32>
    %40 = arith.truncf %39 : vector<8x128xf32> to vector<8x128xbf16>
    %c1_29 = arith.constant 1 : index
    %c0_30 = arith.constant 0 : index
    %c0_31 = arith.constant 0 : index
    %41 = vector.load %arg5[%c1_29, %c0_30, %c0_31] : memref<2x128x128xbf16, #tpu.memory_space<vmem>>, vector<1x128x128xbf16>
    %42 = vector.shape_cast %41 : vector<1x128x128xbf16> to vector<128x128xbf16>
    %cst_32 = arith.constant dense<0.000000e+00> : vector<8x128xf32>
    %43 = tpu.matmul %40, %42, %cst_32 {dimension_numbers = #tpu.dot_dimension_numbers<[1], [0], [0], [1], [0, 0, 1, 1], [], []>} : vector<8x128xbf16>, vector<128x128xbf16>, vector<8x128xf32> -> vector<8x128xf32>
    %c1_33 = arith.constant 1 : index
    %c0_34 = arith.constant 0 : index
    %c0_35 = arith.constant 0 : index
    %44 = vector.load %arg6[%c1_33, %c0_34, %c0_35] : memref<2x1x128xf32, #tpu.memory_space<vmem>>, vector<1x1x128xf32>
    %45 = vector.shape_cast %44 : vector<1x1x128xf32> to vector<1x128xf32>
    %46 = vector.broadcast %45 : vector<1x128xf32> to vector<8x128xf32>
    %47 = arith.addf %43, %46 : vector<8x128xf32>
    %cst_36 = arith.constant 0.000000e+00 : f32
    %48 = vector.broadcast %cst_36 : f32 to vector<8x128xf32>
    %49 = arith.maximumf %47, %48 : vector<8x128xf32>
    %50 = arith.addf %29, %49 : vector<8x128xf32>
    %51 = arith.truncf %50 : vector<8x128xf32> to vector<8x128xbf16>
    %c0_37 = arith.constant 0 : index
    %c0_38 = arith.constant 0 : index
    %52 = vector.load %arg7[%c0_37, %c0_38] : memref<128x128xbf16, #tpu.memory_space<vmem>>, vector<128x128xbf16>
    %cst_39 = arith.constant dense<0.000000e+00> : vector<8x128xf32>
    %53 = tpu.matmul %51, %52, %cst_39 {dimension_numbers = #tpu.dot_dimension_numbers<[1], [0], [0], [1], [0, 0, 1, 1], [], []>} : vector<8x128xbf16>, vector<128x128xbf16>, vector<8x128xf32> -> vector<8x128xf32>
    %c0_40 = arith.constant 0 : index
    %c0_41 = arith.constant 0 : index
    %54 = vector.load %arg8[%c0_40, %c0_41] : memref<1x128xf32, #tpu.memory_space<vmem>>, vector<1x128xf32>
    %55 = vector.broadcast %54 : vector<1x128xf32> to vector<8x128xf32>
    %56 = arith.addf %53, %55 : vector<8x128xf32>
    %c0_42 = arith.constant 0 : index
    %c0_43 = arith.constant 0 : index
    %57 = vector.load %arg9[%c0_42, %c0_43] : memref<8x128xf32, #tpu.memory_space<vmem>>, vector<8x128xf32>
    tpu.vector_store %arg9[%c0_42, %c0_43], %56 {strides = array<i32>} : memref<8x128xf32, #tpu.memory_space<vmem>>, vector<8x128xf32>,
    return
  }
}

</mosaic_0001>

<bundles_post_ra>
// kernel: _forward_impl.1
= control target key start
LH: loop header
LB: loop body
LE: loop exit
PB: predicated region body
PF: predicated region fallthrough
CT: control target
= control target key end

     0   :  { %14 = vsyncpa [#allocation3], 0  ;;  %s1349_s0 = inlined_call_operand.hbm [shape: f32[8,32], index: 0, kind: input, shape index: {}]   ;;  %s1350_s1 = inlined_call_operand.hbm [shape: bf16[32,128], index: 1, kind: input, shape index: {}]   ;;  %s1351_s2 = inlined_call_operand.vmem [shape: f32[1,128], index: 2, kind: input, shape index: {}]   ;;  %s1352_s3 = inlined_call_operand.hbm [shape: bf16[2,128,128], index: 3, kind: input, shape index: {}]   ;;  %s1353_s4 = inlined_call_operand.vmem [shape: f32[2,1,128], index: 4, kind: input, shape index: {}]   ;;  %s1354_s5 = inlined_call_operand.hbm [shape: bf16[2,128,128], index: 5, kind: input, shape index: {}]   ;;  %s1355_s6 = inlined_call_operand.vmem [shape: f32[2,1,128], index: 6, kind: input, shape index: {}]   ;;  %s1356_s7 = inlined_call_operand.hbm [shape: bf16[128,128], index: 7, kind: input, shape index: {}]   ;;  %s1357_s8 = inlined_call_operand.hbm [shape: f32[1,128], index: 8, kind: input, shape index: {}]   ;;  %s1358_s9 = inlined_call_operand.hbm [shape: f32[8,128], index: 9, kind: output, shape index: {}]  }
   0x1   :  { %15 = vsyncpa [#allocation6], 0 }
   0x2   :  { %16 = vsyncpa [#allocation9], 0 }
   0x3   :  { %17 = vsyncpa [#allocation12], 0 }
   0x4   :  { %18 = vsyncpa [#allocation4], 0  ;;  %s1181_s30 = smov [#allocation5]  }
   0x5   :  { %s34_s10 = sshll.u32 %s1181_s30, 4  ;;  %s35_s10 = int_to_ptr.vmem [resolvable:$true] %s34_s10 }
   0x6   :  { %s1039_s11 = scalar_lea.vmem %s35_s10, 256  ;;  %p1044_p1 = scmp.lt.s32.totalorder %s35_s10, %s35_s10 }
   0x7   :  { %p1040_p0 = scmp.ne.s32.totalorder %s35_s10, %s1039_s11  ;;  %p1045_p2 = scmp.lt.s32.totalorder %s1039_s11, %s1039_s11 }
   0x9   :  { %p1046_p3 = por %p1045_p2, %p1044_p1 }
   0xb   :  { %p1047_p4 = pnand %p1046_p3, %p1040_p0 }
   0xd   :  { %1050 = shalt.err (!%p1047_p4)
}
   0xe   :  { %s1182_s12 = smov 64   ;;  %s1183_s13 = smov 4  }
   0xf   :  { %40 = dma.hbm_to_vmem [thread:$0]  %s1350_s1, 256, %s35_s10, [#allocation6], %s1182_s12, %s1182_s12, %s1183_s13  }
  0x10   :  { %s1184_s16 = smov [#allocation8]   ;;  %s1185_s18 = smov [#allocation2]  }
  0x11   :  { %s62_s17 = sshll.u32 %s1184_s16, 4  ;;  %s25_s19 = sshll.u32 %s1185_s18, 4  ;;  %s63_s17 = int_to_ptr.vmem [resolvable:$true] %s62_s17  ;;  %s26_s19 = int_to_ptr.vmem [resolvable:$true] %s25_s19 }
  0x12   :  { %s1059_s20 = scalar_lea.vmem %s63_s17, 2048  ;;  %p1064_p6 = scmp.lt.s32.totalorder %s63_s17, %s63_s17 }
  0x13   :  { %p1060_p5 = scmp.ne.s32.totalorder %s63_s17, %s1059_s20  ;;  %p1065_p7 = scmp.lt.s32.totalorder %s1059_s20, %s1059_s20 }
  0x15   :  { %p1066_p8 = por %p1065_p7, %p1064_p6 }
  0x17   :  { %p1067_p9 = pnand %p1066_p8, %p1060_p5 }
  0x19   :  { %1070 = shalt.err (!%p1067_p9)
}
  0x1a   :  { %68 = dma.hbm_to_vmem [thread:$0]  %s1354_s5, 2048, %s63_s17, [#allocation9], %s1182_s12, %s1182_s12, %s1183_s13  }
  0x1b   :  { %s1079_s1 = scalar_lea.vmem %s26_s19, 128  ;;  %p1084_p11 = scmp.lt.s32.totalorder %s26_s19, %s26_s19 }
  0x1c   :  { %p1080_p10 = scmp.ne.s32.totalorder %s26_s19, %s1079_s1  ;;  %p1085_p12 = scmp.lt.s32.totalorder %s1079_s1, %s1079_s1 }
  0x1e   :  { %p1086_p13 = por %p1085_p12, %p1084_p11 }
  0x20   :  { %p1087_p0 = pnand %p1086_p13, %p1080_p10 }
  0x22   :  { %1090 = shalt.err (!%p1087_p0)
}
  0x23   :  { %28 = dma.hbm_to_vmem [thread:$0]  %s1349_s0, 128, %s26_s19, [#allocation3]  }
  0x24   :  { %s1186_s25 = smov [#allocation7]   ;;  %s1187_s27 = smov [#allocation10]  }
  0x25   :  { %s48_s26 = sshll.u32 %s1186_s25, 4  ;;  %s76_s28 = sshll.u32 %s1187_s27, 4  ;;  %s49_s26 = int_to_ptr.vmem [resolvable:$true] %s48_s26  ;;  %s77_s28 = int_to_ptr.vmem [resolvable:$true] %s76_s28 }
  0x26   :  { %s1099_s29 = scalar_lea.vmem %s49_s26, 2048  ;;  %p1104_p2 = scmp.lt.s32.totalorder %s49_s26, %s49_s26 }
  0x27   :  { %p1100_p1 = scmp.ne.s32.totalorder %s49_s26, %s1099_s29  ;;  %p1105_p3 = scmp.lt.s32.totalorder %s1099_s29, %s1099_s29 }
  0x29   :  { %p1106_p4 = por %p1105_p3, %p1104_p2 }
  0x2b   :  { %p1107_p5 = pnand %p1106_p4, %p1100_p1 }
  0x2d   :  { %1110 = shalt.err (!%p1107_p5)
}
  0x2e   :  { %54 = dma.hbm_to_vmem [thread:$0]  %s1352_s3, 2048, %s49_s26, [#allocation6], %s1182_s12, %s1182_s12, %s1183_s13  }
  0x2f   :  { %s1119_s0 = scalar_lea.vmem %s77_s28, 1024  ;;  %p1124_p7 = scmp.lt.s32.totalorder %s77_s28, %s77_s28 }
  0x30   :  { %p1120_p6 = scmp.ne.s32.totalorder %s77_s28, %s1119_s0  ;;  %p1125_p8 = scmp.lt.s32.totalorder %s1119_s0, %s1119_s0 }
  0x32   :  { %p1126_p9 = por %p1125_p8, %p1124_p7 }
  0x34   :  { %p1127_p10 = pnand %p1126_p9, %p1120_p6 }
  0x36   :  { %1130 = shalt.err (!%p1127_p10)
}
  0x37   :  { %82 = dma.hbm_to_vmem [thread:$0]  %s1356_s7, 1024, %s77_s28, [#allocation9], %s1182_s12, %s1182_s12, %s1183_s13  }
  0x38   :  { %s1188_s14 = smov [#allocation11]  }
  0x39   :  { %s89_s15 = sshll.u32 %s1188_s14, 4  ;;  %s90_s15 = int_to_ptr.vmem [resolvable:$true] %s89_s15 }
  0x3a   :  { %s1139_s16 = scalar_lea.vmem %s90_s15, 16  ;;  %s1143_s3 = scalar_lea.vmem %s90_s15, 32 }
  0x3b   :  { %p1140_p11 = scmp.ne.s32.totalorder %s90_s15, %s1139_s16  ;;  %p1144_p12 = scmp.lt.s32.totalorder %s90_s15, %s90_s15 }
  0x3c   :  { %p1145_p13 = scmp.lt.s32.totalorder %s1143_s3, %s1139_s16 }
  0x3e   :  { %p1146_p0 = por %p1145_p13, %p1144_p12 }
  0x40   :  { %p1147_p1 = pnand %p1146_p0, %p1140_p11 }
  0x42   :  { %1150 = shalt.err (!%p1147_p1)
}
  0x43   :  { %92 = dma.hbm_to_vmem [thread:$0]  %s1357_s8, 16, %s90_s15, [#allocation12]  }
  0x44   :  { %1171 = dma.done.wait [#allocation3], 128  }
  0x45   :  { %1172 = vsyncadd [#allocation3], 4294967168 }
  0x46   :  { %1173 = dma.done.wait [#allocation6], 2304  }
  0x47   :  { %1174 = vsyncadd [#allocation6], 4294964992 }
  0x48   :  { %1175 = dma.done.wait [#allocation9], 3072  }
  0x49   :  { %1176 = vsyncadd [#allocation9], 4294964224 }
  0x4a   :  { %1177 = dma.done.wait [#allocation12], 16  }
  0x4b   :  { %1178 = vsyncadd [#allocation12], 4294967280  ;;  %v1189_v0 = vmov 0.0   ;;  %vm1190_vm0 = vmmov 0   ;;  %v989_v1 = vld [vmem:[#allocation5 + $0x8] sm:$0xff]   ;;  %v990_v2 = vld [vmem:[#allocation5] sm:$0xff]  }
  0x4c   :  { %870 = vmatprep.subr.bf16.mxu0 %v1189_v0  ;;  %874 = vmatprep.mubr.msk.bf16.mxu0 %vm1190_vm0, %v1189_v0  ;;  %v112_v3 = vld [vmem:[#allocation2] sm:$0xff]  ;;  %v991_v4 = vld [vmem:[#allocation7 + $0x38] sm:$0xff]   ;;  %v992_v6 = vld [vmem:[#allocation7 + $0x30] sm:$0xff]   ;;  %vm137_vm1 = vcmask 261120  }
  0x4d   :  { %878 = vmatprep.subr.bf16.mxu1 %v1189_v0  ;;  %894 = vmatprep.mubr.msk.bf16.mxu1 %vm1190_vm0, %v1189_v0  ;;  %v113_v5 = vpack.c.bf16 %v112_v3, %v112_v3  ;;  %v993_v7 = vld [vmem:[#allocation7 + $0x28] sm:$0xff]   ;;  %v994_v8 = vld [vmem:[#allocation7 + $0x20] sm:$0xff]   ;;  %v995_v9 = vld [vmem:[#allocation7 + $0x18] sm:$0xff]  }
  0x4e   :  { %871 = vmatpush3.bf16.msra.mxu0 %v989_v1  ;;  %879 = vmatpush3.bf16.msra.mxu1 %v991_v4  ;;  %v996_v10 = vld [vmem:[#allocation7 + $0x10] sm:$0xff]   ;;  %v997_v11 = vld [vmem:[#allocation7 + $0x8] sm:$0xff]   ;;  %v998_v12 = vld [vmem:[#allocation7] sm:$0xff]  }
  0x4f   :  { %872 = vmatprep.subr.bf16.mxu0 %v1189_v0  ;;  %880 = vmatprep.subr.bf16.mxu1 %v1189_v0  ;;  %v999_v13 = vld [vmem:[#allocation8 + $0x38] sm:$0xff]   ;;  %v1000_v14 = vld [vmem:[#allocation8 + $0x30] sm:$0xff]   ;;  %v1001_v15 = vld [vmem:[#allocation8 + $0x28] sm:$0xff]  }
  0x50   :  { %v1002_v16 = vld [vmem:[#allocation8 + $0x20] sm:$0xff]   ;;  %v1003_v17 = vld [vmem:[#allocation8 + $0x18] sm:$0xff]   ;;  %v1004_v18 = vld [vmem:[#allocation8 + $0x10] sm:$0xff]  }
  0x51   :  { %v771_v19 = vld [vmem:[%s1351_s2] ss:$0 sm:$0xff]  ;;  %v1006_v28 = vld [vmem:[#allocation8] sm:$0xff]   ;;  %v1007_v29 = vld [vmem:[#allocation7 + $0x78] sm:$0xff]  }
  0x52   :  { %873 = vmatpush3.bf16.msra.mxu0 %v990_v2  ;;  %881 = vmatpush3.bf16.msra.mxu1 %v992_v6  ;;  %v1005_v27 = vld [vmem:[#allocation8 + $0x8] sm:$0xff]   ;;  %v1008_v30 = vld [vmem:[#allocation7 + $0x70] sm:$0xff]   ;;  %v1010_v32 = vld [vmem:[#allocation7 + $0x60] sm:$0xff]  }
  0x53   :  { %898 = vmatprep.subr.bf16.mxu0 %v1189_v0  ;;  %882 = vmatprep.subr.bf16.mxu1 %v1189_v0  ;;  %v1009_v31 = vld [vmem:[#allocation7 + $0x68] sm:$0xff]   ;;  %v1011_v33 = vld [vmem:[#allocation7 + $0x58] sm:$0xff]   ;;  %v1012_v34 = vld [vmem:[#allocation7 + $0x50] sm:$0xff]  }
  0x54   :  { %v775_v35 = vld [vmem:[%s1353_s4] ss:$0 sm:$0xff]  ;;  %v1014_v44 = vld [vmem:[#allocation7 + $0x40] sm:$0xff]   ;;  %v1015_v45 = vld [vmem:[#allocation8 + $0x78] sm:$0xff]  }
  0x55   :  { %875 = vmatmul.mubr.msk.bf16.vlgmr.msra.gmra.mxu0 %vm137_vm1, %v113_v5  ;;  %v1013_v43 = vld [vmem:[#allocation7 + $0x48] sm:$0xff]   ;;  %v1016_v46 = vld [vmem:[#allocation8 + $0x70] sm:$0xff]   ;;  %v1018_v48 = vld [vmem:[#allocation8 + $0x60] sm:$0xff]  }
  0x56   :  { %914 = vmatprep.mubr.msk.bf16.mxu0 %vm1190_vm0, %v1189_v0  ;;  %883 = vmatpush3.bf16.msra.mxu1 %v993_v7  ;;  %v1017_v47 = vld [vmem:[#allocation8 + $0x68] sm:$0xff]   ;;  %v1019_v49 = vld [vmem:[#allocation8 + $0x58] sm:$0xff]   ;;  %v1020_v50 = vld [vmem:[#allocation8 + $0x50] sm:$0xff]  }
  0x57   :  { %884 = vmatprep.subr.bf16.mxu1 %v1189_v0  ;;  %899 = vmatpush3.bf16.msra.mxu0 %v999_v13  ;;  %v784_v51 = vld [vmem:[%s1355_s6] ss:$0 sm:$0xff]  ;;  %v1022_v61 = vld [vmem:[#allocation8 + $0x40] sm:$0xff]   ;;  %v1023_v62 = vld [vmem:[#allocation10 + $0x38] sm:$0xff]  }
  0x58   :  { %900 = vmatprep.subr.bf16.mxu0 %v1189_v0  ;;  %v1021_v60 = vld [vmem:[#allocation8 + $0x48] sm:$0xff]   ;;  %v1024_v63 = vld [vmem:[#allocation10 + $0x30] sm:$0xff]   ;;  %v1026_v2 = vld [vmem:[#allocation10 + $0x20] sm:$0xff]  }
  0x59   :  { %v1025_v1 = vld [vmem:[#allocation10 + $0x28] sm:$0xff]   ;;  %v1027_v3 = vld [vmem:[#allocation10 + $0x18] sm:$0xff]   ;;  %v1028_v4 = vld [vmem:[#allocation10 + $0x10] sm:$0xff]  }
  0x5a   :  { %885 = vmatpush3.bf16.msra.mxu1 %v994_v8  ;;  %v794_v5 = vld [vmem:[%s1353_s4 + $0x1] ss:$0 sm:$0xff]  ;;  %s1191_s4 = smov [#allocation13]  }
  0x5b   :  { %886 = vmatprep.subr.bf16.mxu1 %v1189_v0  ;;  %901 = vmatpush3.bf16.msra.mxu0 %v1000_v14  ;;  %v1029_v13 = vld [vmem:[#allocation10 + $0x8] sm:$0xff]   ;;  %v1030_v14 = vld [vmem:[#allocation10] sm:$0xff]   ;;  %s759_s23 = sshll.u32 %s1191_s4, 4  ;;  %s760_s23 = int_to_ptr.vmem [resolvable:$true] %s759_s23 }
  0x5c   :  { %902 = vmatprep.subr.bf16.mxu0 %v1189_v0  ;;  %s1151_s24 = scalar_lea.vmem %s760_s23, 128  ;;  %p1156_p3 = scmp.lt.s32.totalorder %s760_s23, %s760_s23 }
  0x5d   :  { %p1152_p2 = scmp.ne.s32.totalorder %s760_s23, %s1151_s24  ;;  %p1157_p4 = scmp.lt.s32.totalorder %s1151_s24, %s1151_s24 }
  0x5e   :  { %887 = vmatpush3.bf16.msra.mxu1 %v995_v9 }
  0x5f   :  { %888 = vmatprep.subr.bf16.mxu1 %v1189_v0  ;;  %903 = vmatpush3.bf16.msra.mxu0 %v1001_v15  ;;  %v804_v15 = vld [vmem:[%s1355_s6 + $0x1] ss:$0 sm:$0xff]  ;;  %p1158_p5 = por %p1157_p4, %p1156_p3 }
  0x60   :  { %904 = vmatprep.subr.bf16.mxu0 %v1189_v0 }
  0x61   :  { %p1159_p6 = pnand %p1158_p5, %p1152_p2 }
  0x62   :  { %889 = vmatpush3.bf16.msra.mxu1 %v996_v10 }
  0x63   :  { %890 = vmatprep.subr.bf16.mxu1 %v1189_v0  ;;  %905 = vmatpush3.bf16.msra.mxu0 %v1002_v16 }
  0x64   :  { %906 = vmatprep.subr.bf16.mxu0 %v1189_v0 }
  0x66   :  { %891 = vmatpush3.bf16.msra.mxu1 %v997_v11 }
  0x67   :  { %892 = vmatprep.subr.bf16.mxu1 %v1189_v0  ;;  %907 = vmatpush3.bf16.msra.mxu0 %v1003_v17 }
  0x68   :  { %908 = vmatprep.subr.bf16.mxu0 %v1189_v0 }
  0x6a   :  { %893 = vmatpush3.bf16.msra.mxu1 %v998_v12 }
  0x6b   :  { %918 = vmatprep.subr.bf16.mxu1 %v1189_v0  ;;  %909 = vmatpush3.bf16.msra.mxu0 %v1004_v18 }
  0x6c   :  { %910 = vmatprep.subr.bf16.mxu0 %v1189_v0 }
  0x6f   :  { %911 = vmatpush3.bf16.msra.mxu0 %v1005_v27 }
  0x70   :  { %912 = vmatprep.subr.bf16.mxu0 %v1189_v0 }
  0x73   :  { %913 = vmatpush3.bf16.msra.mxu0 %v1006_v28 }
  0x74   :  { %938 = vmatprep.subr.bf16.mxu0 %v1189_v0 }
 0x115   :  { %v175_v20 = vpop.f32.mrf.mxu0 }
 0x116   :  { %v176_v21 = vadd.f32 %v771_v19, %v175_v20 }
 0x117   :  { %v876_v22 = vpop.f32.mrf.mxu0 }
 0x118   :  { %v1299_v23 = vmax.f32 %v176_v21, 0.0 }
 0x119   :  { %v178_v24 = vpop.f32.mrf.mxu0 }
 0x11a   :  { %v182_v25 = vpack.c.bf16 %v1299_v23, %v1299_v23  ;;  %v813_v24 = vld [vmem:[#allocation11] ss:$0 sm:$0xff] }
 0x11b   :  { %v877_v26 = vpop.f32.mrf.mxu0 }
 0x11c   :  { %895 = vmatmul.mubr.bf16.vlgmr.msra.gmra.mxu1 %v182_v25 }
 0x11d   :  { %934 = vmatprep.mubr.msk.bf16.mxu1 %vm1190_vm0, %v1189_v0  ;;  %919 = vmatpush3.bf16.msra.mxu1 %v1007_v29 }
 0x11e   :  { %920 = vmatprep.subr.bf16.mxu1 %v1189_v0 }
 0x121   :  { %921 = vmatpush3.bf16.msra.mxu1 %v1008_v30 }
 0x122   :  { %922 = vmatprep.subr.bf16.mxu1 %v1189_v0 }
 0x125   :  { %923 = vmatpush3.bf16.msra.mxu1 %v1009_v31 }
 0x126   :  { %924 = vmatprep.subr.bf16.mxu1 %v1189_v0 }
 0x129   :  { %925 = vmatpush3.bf16.msra.mxu1 %v1010_v32 }
 0x12a   :  { %926 = vmatprep.subr.bf16.mxu1 %v1189_v0 }
 0x12d   :  { %927 = vmatpush3.bf16.msra.mxu1 %v1011_v33 }
 0x12e   :  { %928 = vmatprep.subr.bf16.mxu1 %v1189_v0 }
 0x131   :  { %929 = vmatpush3.bf16.msra.mxu1 %v1012_v34 }
 0x132   :  { %930 = vmatprep.subr.bf16.mxu1 %v1189_v0 }
 0x135   :  { %931 = vmatpush3.bf16.msra.mxu1 %v1013_v43 }
 0x136   :  { %932 = vmatprep.subr.bf16.mxu1 %v1189_v0 }
 0x139   :  { %933 = vmatpush3.bf16.msra.mxu1 %v1014_v44 }
 0x13a   :  { %958 = vmatprep.subr.bf16.mxu1 %v1189_v0 }
 0x1dc   :  { %v288_v36 = vpop.f32.mrf.mxu1 }
 0x1dd   :  { %v289_v37 = vadd.f32 %v775_v35, %v288_v36 }
 0x1de   :  { %v896_v38 = vpop.f32.mrf.mxu1 }
 0x1df   :  { %v294_v39 = vmax.f32 %v289_v37, 0.0 }
 0x1e0   :  { %v291_v40 = vpop.f32.mrf.mxu1 }
 0x1e1   :  { %v295_v41 = vpack.c.bf16 %v294_v39, %v294_v39 }
 0x1e2   :  { %v897_v42 = vpop.f32.mrf.mxu1 }
 0x1e3   :  { %915 = vmatmul.mubr.bf16.vlgmr.msra.gmra.mxu0 %v295_v41 }
 0x1e4   :  { %954 = vmatprep.mubr.msk.bf16.mxu0 %vm1190_vm0, %v1189_v0  ;;  %939 = vmatpush3.bf16.msra.mxu0 %v1015_v45 }
 0x1e5   :  { %940 = vmatprep.subr.bf16.mxu0 %v1189_v0 }
 0x1e8   :  { %941 = vmatpush3.bf16.msra.mxu0 %v1016_v46 }
 0x1e9   :  { %942 = vmatprep.subr.bf16.mxu0 %v1189_v0 }
 0x1ec   :  { %943 = vmatpush3.bf16.msra.mxu0 %v1017_v47 }
 0x1ed   :  { %944 = vmatprep.subr.bf16.mxu0 %v1189_v0 }
 0x1f0   :  { %945 = vmatpush3.bf16.msra.mxu0 %v1018_v48 }
 0x1f1   :  { %946 = vmatprep.subr.bf16.mxu0 %v1189_v0 }
 0x1f4   :  { %947 = vmatpush3.bf16.msra.mxu0 %v1019_v49 }
 0x1f5   :  { %948 = vmatprep.subr.bf16.mxu0 %v1189_v0 }
 0x1f8   :  { %949 = vmatpush3.bf16.msra.mxu0 %v1020_v50 }
 0x1f9   :  { %950 = vmatprep.subr.bf16.mxu0 %v1189_v0 }
 0x1fc   :  { %951 = vmatpush3.bf16.msra.mxu0 %v1021_v60 }
 0x1fd   :  { %952 = vmatprep.subr.bf16.mxu0 %v1189_v0 }
 0x200   :  { %953 = vmatpush3.bf16.msra.mxu0 %v1022_v61 }
 0x2a3   :  { %v401_v52 = vpop.f32.mrf.mxu0 }
 0x2a4   :  { %v402_v53 = vadd.f32 %v784_v51, %v401_v52 }
 0x2a5   :  { %v916_v54 = vpop.f32.mrf.mxu0 }
 0x2a6   :  { %v407_v55 = vmax.f32 %v402_v53, 0.0 }
 0x2a7   :  { %v404_v56 = vpop.f32.mrf.mxu0 }
 0x2a8   :  { %v408_v57 = vadd.f32 %v407_v55, %v1299_v23 }
 0x2a9   :  { %v917_v58 = vpop.f32.mrf.mxu0 }
 0x2aa   :  { %v409_v59 = vpack.c.bf16 %v408_v57, %v408_v57 }
 0x2ac   :  { %935 = vmatmul.mubr.bf16.vlgmr.msra.gmra.mxu1 %v409_v59 }
 0x2ad   :  { %974 = vmatprep.mubr.msk.bf16.mxu1 %vm1190_vm0, %v1189_v0  ;;  %959 = vmatpush3.bf16.msra.mxu1 %v1023_v62 }
 0x2ae   :  { %960 = vmatprep.subr.bf16.mxu1 %v1189_v0 }
 0x2b1   :  { %961 = vmatpush3.bf16.msra.mxu1 %v1024_v63 }
 0x2b2   :  { %962 = vmatprep.subr.bf16.mxu1 %v1189_v0 }
 0x2b5   :  { %963 = vmatpush3.bf16.msra.mxu1 %v1025_v1 }
 0x2b6   :  { %964 = vmatprep.subr.bf16.mxu1 %v1189_v0 }
 0x2b9   :  { %965 = vmatpush3.bf16.msra.mxu1 %v1026_v2 }
 0x2ba   :  { %966 = vmatprep.subr.bf16.mxu1 %v1189_v0 }
 0x2bd   :  { %967 = vmatpush3.bf16.msra.mxu1 %v1027_v3 }
 0x2be   :  { %968 = vmatprep.subr.bf16.mxu1 %v1189_v0 }
 0x2c1   :  { %969 = vmatpush3.bf16.msra.mxu1 %v1028_v4 }
 0x2c2   :  { %970 = vmatprep.subr.bf16.mxu1 %v1189_v0 }
 0x2c5   :  { %971 = vmatpush3.bf16.msra.mxu1 %v1029_v13 }
 0x2c6   :  { %972 = vmatprep.subr.bf16.mxu1 %v1189_v0 }
 0x2c9   :  { %973 = vmatpush3.bf16.msra.mxu1 %v1030_v14 }
 0x36c   :  { %v517_v6 = vpop.f32.mrf.mxu1 }
 0x36d   :  { %v518_v7 = vadd.f32 %v794_v5, %v517_v6 }
 0x36e   :  { %v936_v8 = vpop.f32.mrf.mxu1 }
 0x36f   :  { %v523_v9 = vmax.f32 %v518_v7, 0.0 }
 0x370   :  { %v520_v10 = vpop.f32.mrf.mxu1 }
 0x371   :  { %v524_v11 = vpack.c.bf16 %v523_v9, %v523_v9 }
 0x372   :  { %v937_v12 = vpop.f32.mrf.mxu1 }
 0x373   :  { %955 = vmatmul.mubr.bf16.vlgmr.msra.gmra.mxu0 %v524_v11 }
 0x433   :  { %v632_v16 = vpop.f32.mrf.mxu0 }
 0x434   :  { %v633_v17 = vadd.f32 %v804_v15, %v632_v16 }
 0x435   :  { %v956_v18 = vpop.f32.mrf.mxu0 }
 0x436   :  { %v638_v19 = vmax.f32 %v633_v17, 0.0 }
 0x437   :  { %v635_v20 = vpop.f32.mrf.mxu0 }
 0x438   :  { %v639_v21 = vadd.f32 %v638_v19, %v408_v57 }
 0x439   :  { %v957_v22 = vpop.f32.mrf.mxu0 }
 0x43a   :  { %v640_v23 = vpack.c.bf16 %v639_v21, %v639_v21 }
 0x43c   :  { %975 = vmatmul.mubr.bf16.vlgmr.msra.gmra.mxu1 %v640_v23 }
 0x4fc   :  { %v746_v25 = vpop.f32.mrf.mxu1 }
 0x4fd   :  { %v747_v0 = vadd.f32 %v813_v24, %v746_v25 }
 0x4fe   :  { %v976_v26 = vpop.f32.mrf.mxu1 }
 0x4ff   :  { %752 = vst [vmem:[#allocation13] sm:$0xff] %v747_v0 }
 0x500   :  { %v749_v27 = vpop.f32.mrf.mxu1 }
 0x501   :  { %1162 = shalt.err (!%p1159_p6)
}
 0x502   :  { %762 = dma.vmem_to_hbm [thread:$0]  %s760_s23, 128, %s1358_s9, [#allocation4]   ;;  %v977_v28 = vpop.f32.mrf.mxu1 }
 0x503   :  { %1179 = dma.done.wait [#allocation4], 128  }
 0x504   :  { %1180 = vsyncadd [#allocation4], 4294967168 }
 0x505   :  { %766 = vsyncpa [#allocation3], 1 }
 0x506   :  { %767 = vsyncpa [#allocation6], 1 }
 0x507   :  { %768 = vsyncpa [#allocation9], 1 }
 0x508   :  { %769 = vsyncpa [#allocation12], 1 }
 0x509   :  { %770 = vsyncpa [#allocation4], 1 }

</bundles_post_ra>
